<compile_context>
chip_gen: v7x
topology: tpu7x:2x2x1
jax: 0.10.0
libtpu: 0.0.40
codegen_flags: <defaults>
</compile_context>

<pallas_src>
import jax
import jax.numpy as jnp
from jax.experimental import pallas as pl
from jax.experimental.pallas import tpu as pltpu


def _mlp_kernel(mean_ref, inv_ref, x_ref, w1_ref, b1_ref, w2_ref, b2_ref,
                w3_ref, b3_ref, o_ref):
    # StandardScaler normalize with precomputed full-batch stats.
    # x_ref: (F, TB) -- features on sublanes, batch tile on lanes.
    xn = (x_ref[...] - mean_ref[...]) * inv_ref[...]

    # Linear -> ReLU -> Linear -> ReLU -> Linear in (hidden, batch) layout:
    # h = W @ x + b, with W as (out, in) and b as (out, 1).
    h1 = jnp.dot(w1_ref[...], xn, preferred_element_type=jnp.float32) + b1_ref[...]
    h1 = jnp.maximum(h1, 0.0)
    h2 = jnp.dot(w2_ref[...], h1, preferred_element_type=jnp.float32) + b2_ref[...]
    h2 = jnp.maximum(h2, 0.0)
    y = jnp.dot(w3_ref[...], h2, preferred_element_type=jnp.float32) + b3_ref[...]
    o_ref[...] = y.astype(o_ref.dtype)


def _round_up(n, m):
    return ((n + m - 1) // m) * m


def torch_nn_forward(x, params, *, block_batch=1024):
    """x: (batch, input_size). params: list of (W, b) with W in PyTorch (out, in) layout."""
    (w1, b1), (w2, b2), (w3, b3) = params
    B, F = x.shape
    H1, H2, O = w1.shape[0], w2.shape[0], w3.shape[0]

    xf = x.astype(jnp.float32)

    # --- StandardScaler.fit_transform stats over the FULL batch (plain JAX) ---
    # Per-feature mean / population std (ddof=0); zero-variance features -> scale 1.
    mean = jnp.mean(xf, axis=0)                              # (F,)
    var = jnp.mean((xf - mean[None, :]) ** 2, axis=0)        # (F,)
    inv = jnp.where(var == 0.0, 1.0, jax.lax.rsqrt(var))     # 1/std

    # --- Lane-dense layout: batch -> lanes ---
    tb = min(block_batch, _round_up(B, 128))     # batch tile (lane dim), mult. of 128
    b_pad = _round_up(B, tb)
    x_t = jnp.pad(xf.T, ((0, 0), (0, b_pad - B)))            # (F, B_pad)

    mean_c = mean[:, None]                                   # (F, 1)
    inv_c = inv[:, None]                                     # (F, 1)
    b1c, b2c, b3c = b1[:, None], b2[:, None], b3[:, None]    # (out, 1)

    grid = (b_pad // tb,)
    const = lambda i: (0, 0)   # weights / biases / stats: VMEM-resident (constant block)
    tile = lambda i: (0, i)    # x / output: tiled along the batch (lane) axis

    flops = 2 * B * (F * H1 + H1 * H2 + H2 * O)
    bytes_accessed = 4 * (B * (F + O) + F * H1 + H1 * H2 + H2 * O
                          + H1 + H2 + O + 2 * F)

    y_t = pl.pallas_call(
        _mlp_kernel,
        out_shape=jax.ShapeDtypeStruct((O, b_pad), jnp.float32),
        grid=grid,
        in_specs=[
            pl.BlockSpec((F, 1), const),     # mean
            pl.BlockSpec((F, 1), const),     # 1/std
            pl.BlockSpec((F, tb), tile),     # x tile (features x batch_tile)
            pl.BlockSpec((H1, F), const),    # W1 (out, in)
            pl.BlockSpec((H1, 1), const),    # b1
            pl.BlockSpec((H2, H1), const),   # W2
            pl.BlockSpec((H2, 1), const),    # b2
            pl.BlockSpec((O, H2), const),    # W3
            pl.BlockSpec((O, 1), const),     # b3
        ],
        out_specs=pl.BlockSpec((O, tb), tile),
        compiler_params=pltpu.CompilerParams(
            dimension_semantics=("parallel",),
            vmem_limit_bytes=32 * 1024 * 1024,
        ),
        cost_estimate=pl.CostEstimate(
            flops=flops, transcendentals=0, bytes_accessed=bytes_accessed),
    )(mean_c, inv_c, x_t, w1, b1c, w2, b2c, w3, b3c)

    # Back to the PyTorch (batch, out) layout, dropping padded lanes.
    return y_t[:, :B].T


def init_params(key, input_size, shape, output_size):
    """Deterministic PyTorch-style Linear init: uniform(-1/sqrt(fan_in), +1/sqrt(fan_in))."""
    # Layer dims replicating TorchNN.__init__ with shape=(s0, s1, s1):
    #   Linear(input_size, shape[0]), ReLU, Linear(shape[0], shape[1]), ReLU,
    #   Linear(shape[-1], output_size)
    dims = [(input_size, shape[0]), (shape[0], shape[1]), (shape[-1], output_size)]
    params = []
    for fan_in, fan_out in dims:
        key, kw, kb = jax.random.split(key, 3)
        bound = 1.0 / float(fan_in) ** 0.5
        w = jax.random.uniform(kw, (fan_out, fan_in), jnp.float32, -bound, bound)
        b = jax.random.uniform(kb, (fan_out,), jnp.float32, -bound, bound)
        params.append((w, b))
    return params


def reference_forward(x, params):
    """Plain-JAX reference matching the PyTorch/sklearn forward."""
    (w1, b1), (w2, b2), (w3, b3) = params
    xf = x.astype(jnp.float32)
    mean = jnp.mean(xf, axis=0)
    std = jnp.sqrt(jnp.mean((xf - mean) ** 2, axis=0))
    scale = jnp.where(std == 0.0, 1.0, std)
    xn = (xf - mean) / scale
    h1 = jnp.maximum(xn @ w1.T + b1, 0.0)
    h2 = jnp.maximum(h1 @ w2.T + b2, 0.0)
    return h2 @ w3.T + b3


if __name__ == "__main__":
    key = jax.random.PRNGKey(0)
    input_size, output_size = 8, 4
    shape = (32, 16, 16)  # -> Linear(8,32)->ReLU->Linear(32,16)->ReLU->Linear(16,4)

    key, kp = jax.random.split(key)
    params = init_params(kp, input_size, shape, output_size)

    # Small batch: single grid step (batch padded to 128 lanes inside the wrapper).
    key, kx = jax.random.split(key)
    x_small = jax.random.normal(kx, (8, input_size), jnp.float32)
    y_small = torch_nn_forward(x_small, params)
    jax.block_until_ready(y_small)
    assert y_small.shape == (8, output_size)
    assert jnp.allclose(y_small, reference_forward(x_small, params),
                        atol=1e-4, rtol=1e-4)

    # Ragged batch exercising the multi-step, double-buffered grid + lane padding.
    key, kx2 = jax.random.split(key)
    x_big = jax.random.normal(kx2, (300, input_size), jnp.float32)
    y_big = torch_nn_forward(x_big, params, block_batch=128)
    jax.block_until_ready(y_big)
    assert y_big.shape == (300, output_size)
    assert jnp.allclose(y_big, reference_forward(x_big, params),
                        atol=1e-4, rtol=1e-4)

    print("KERNEL_OK")
</pallas_src>

<mosaic_0001>
module attributes {stable_mosaic.version = 11 : i64} {
  func.func @_mlp_kernel(%arg0: i32, %arg1: memref<8x1xf32, #tpu.memory_space<vmem>>, %arg2: memref<8x1xf32, #tpu.memory_space<vmem>>, %arg3: memref<8x128xf32, #tpu.memory_space<vmem>>, %arg4: memref<32x8xf32, #tpu.memory_space<vmem>>, %arg5: memref<32x1xf32, #tpu.memory_space<vmem>>, %arg6: memref<16x32xf32, #tpu.memory_space<vmem>>, %arg7: memref<16x1xf32, #tpu.memory_space<vmem>>, %arg8: memref<4x16xf32, #tpu.memory_space<vmem>>, %arg9: memref<4x1xf32, #tpu.memory_space<vmem>>, %arg10: memref<4x128xf32, #tpu.memory_space<vmem>>) attributes {dimension_semantics = [#tpu.dimension_semantics<parallel>], iteration_bounds = array<i64: 1>, scalar_prefetch = 0 : i64, scratch_operands = 0 : i64, tpu.core_type = #tpu.core_type<tc>, window_params = [{pipeline_mode = #tpu.pipeline_mode<synchronous>, transform_indices = @transform_0, window_bounds = array<i64: 8, 1>}, {pipeline_mode = #tpu.pipeline_mode<synchronous>, transform_indices = @transform_1, window_bounds = array<i64: 8, 1>}, {transform_indices = @transform_2, window_bounds = array<i64: 8, 128>}, {pipeline_mode = #tpu.pipeline_mode<synchronous>, transform_indices = @transform_3, window_bounds = array<i64: 32, 8>}, {pipeline_mode = #tpu.pipeline_mode<synchronous>, transform_indices = @transform_4, window_bounds = array<i64: 32, 1>}, {pipeline_mode = #tpu.pipeline_mode<synchronous>, transform_indices = @transform_5, window_bounds = array<i64: 16, 32>}, {pipeline_mode = #tpu.pipeline_mode<synchronous>, transform_indices = @transform_6, window_bounds = array<i64: 16, 1>}, {pipeline_mode = #tpu.pipeline_mode<synchronous>, transform_indices = @transform_7, window_bounds = array<i64: 4, 16>}, {pipeline_mode = #tpu.pipeline_mode<synchronous>, transform_indices = @transform_8, window_bounds = array<i64: 4, 1>}, {transform_indices = @transform_9, window_bounds = array<i64: 4, 128>}]} {
    %c0 = arith.constant 0 : index
    %c0_0 = arith.constant 0 : index
    %0 = vector.load %arg3[%c0, %c0_0] : memref<8x128xf32, #tpu.memory_space<vmem>>, vector<8x128xf32>
    %c0_1 = arith.constant 0 : index
    %c0_2 = arith.constant 0 : index
    %1 = vector.load %arg1[%c0_1, %c0_2] : memref<8x1xf32, #tpu.memory_space<vmem>>, vector<8x1xf32>
    %2 = vector.broadcast %1 : vector<8x1xf32> to vector<8x128xf32>
    %3 = arith.subf %0, %2 : vector<8x128xf32>
    %c0_3 = arith.constant 0 : index
    %c0_4 = arith.constant 0 : index
    %4 = vector.load %arg2[%c0_3, %c0_4] : memref<8x1xf32, #tpu.memory_space<vmem>>, vector<8x1xf32>
    %5 = vector.broadcast %4 : vector<8x1xf32> to vector<8x128xf32>
    %6 = arith.mulf %3, %5 : vector<8x128xf32>
    %c0_5 = arith.constant 0 : index
    %c0_6 = arith.constant 0 : index
    %7 = vector.load %arg4[%c0_5, %c0_6] : memref<32x8xf32, #tpu.memory_space<vmem>>, vector<32x8xf32>
    %cst = arith.constant dense<0.000000e+00> : vector<32x128xf32>
    %8 = tpu.matmul %7, %6, %cst {dimension_numbers = #tpu.dot_dimension_numbers<[1], [0], [0], [1], [0, 0, 1, 1], [], []>} : vector<32x8xf32>, vector<8x128xf32>, vector<32x128xf32> -> vector<32x128xf32>
    %c0_7 = arith.constant 0 : index
    %c0_8 = arith.constant 0 : index
    %9 = vector.load %arg5[%c0_7, %c0_8] : memref<32x1xf32, #tpu.memory_space<vmem>>, vector<32x1xf32>
    %10 = vector.broadcast %9 : vector<32x1xf32> to vector<32x128xf32>
    %11 = arith.addf %8, %10 : vector<32x128xf32>
    %cst_9 = arith.constant 0.000000e+00 : f32
    %12 = vector.broadcast %cst_9 : f32 to vector<32x128xf32>
    %13 = arith.maximumf %11, %12 : vector<32x128xf32>
    %c0_10 = arith.constant 0 : index
    %c0_11 = arith.constant 0 : index
    %14 = vector.load %arg6[%c0_10, %c0_11] : memref<16x32xf32, #tpu.memory_space<vmem>>, vector<16x32xf32>
    %cst_12 = arith.constant dense<0.000000e+00> : vector<16x128xf32>
    %15 = tpu.matmul %14, %13, %cst_12 {dimension_numbers = #tpu.dot_dimension_numbers<[1], [0], [0], [1], [0, 0, 1, 1], [], []>} : vector<16x32xf32>, vector<32x128xf32>, vector<16x128xf32> -> vector<16x128xf32>
    %c0_13 = arith.constant 0 : index
    %c0_14 = arith.constant 0 : index
    %16 = vector.load %arg7[%c0_13, %c0_14] : memref<16x1xf32, #tpu.memory_space<vmem>>, vector<16x1xf32>
    %17 = vector.broadcast %16 : vector<16x1xf32> to vector<16x128xf32>
    %18 = arith.addf %15, %17 : vector<16x128xf32>
    %cst_15 = arith.constant 0.000000e+00 : f32
    %19 = vector.broadcast %cst_15 : f32 to vector<16x128xf32>
    %20 = arith.maximumf %18, %19 : vector<16x128xf32>
    %c0_16 = arith.constant 0 : index
    %c0_17 = arith.constant 0 : index
    %21 = vector.load %arg8[%c0_16, %c0_17] : memref<4x16xf32, #tpu.memory_space<vmem>>, vector<4x16xf32>
    %cst_18 = arith.constant dense<0.000000e+00> : vector<4x128xf32>
    %22 = tpu.matmul %21, %20, %cst_18 {dimension_numbers = #tpu.dot_dimension_numbers<[1], [0], [0], [1], [0, 0, 1, 1], [], []>} : vector<4x16xf32>, vector<16x128xf32>, vector<4x128xf32> -> vector<4x128xf32>
    %c0_19 = arith.constant 0 : index
    %c0_20 = arith.constant 0 : index
    %23 = vector.load %arg9[%c0_19, %c0_20] : memref<4x1xf32, #tpu.memory_space<vmem>>, vector<4x1xf32>
    %24 = vector.broadcast %23 : vector<4x1xf32> to vector<4x128xf32>
    %25 = arith.addf %22, %24 : vector<4x128xf32>
    %c0_21 = arith.constant 0 : index
    %c0_22 = arith.constant 0 : index
    %26 = vector.load %arg10[%c0_21, %c0_22] : memref<4x128xf32, #tpu.memory_space<vmem>>, vector<4x128xf32>
    tpu.vector_store %arg10[%c0_21, %c0_22], %25 {strides = array<i32>} : memref<4x128xf32, #tpu.memory_space<vmem>>, vector<4x128xf32>,
    return
  }
  func.func @transform_0(%arg0: i32) -> (i32, i32) {
    %c0_i32 = arith.constant 0 : i32
    %c0_i32_0 = arith.constant 0 : i32
    %c0_i32_1 = arith.constant 0 : i32
    return %c0_i32, %c0_i32_0 : i32, i32
  }
  func.func @transform_1(%arg0: i32) -> (i32, i32) {
    %c0_i32 = arith.constant 0 : i32
    %c0_i32_0 = arith.constant 0 : i32
    %c0_i32_1 = arith.constant 0 : i32
    return %c0_i32, %c0_i32_0 : i32, i32
  }
  func.func @transform_2(%arg0: i32) -> (i32, i32) {
    %c0_i32 = arith.constant 0 : i32
    %c0_i32_0 = arith.constant 0 : i32
    return %c0_i32, %arg0 : i32, i32
  }
  func.func @transform_3(%arg0: i32) -> (i32, i32) {
    %c0_i32 = arith.constant 0 : i32
    %c0_i32_0 = arith.constant 0 : i32
    %c0_i32_1 = arith.constant 0 : i32
    return %c0_i32, %c0_i32_0 : i32, i32
  }
  func.func @transform_4(%arg0: i32) -> (i32, i32) {
    %c0_i32 = arith.constant 0 : i32
    %c0_i32_0 = arith.constant 0 : i32
    %c0_i32_1 = arith.constant 0 : i32
    return %c0_i32, %c0_i32_0 : i32, i32
  }
  func.func @transform_5(%arg0: i32) -> (i32, i32) {
    %c0_i32 = arith.constant 0 : i32
    %c0_i32_0 = arith.constant 0 : i32
    %c0_i32_1 = arith.constant 0 : i32
    return %c0_i32, %c0_i32_0 : i32, i32
  }
  func.func @transform_6(%arg0: i32) -> (i32, i32) {
    %c0_i32 = arith.constant 0 : i32
    %c0_i32_0 = arith.constant 0 : i32
    %c0_i32_1 = arith.constant 0 : i32
    return %c0_i32, %c0_i32_0 : i32, i32
  }
  func.func @transform_7(%arg0: i32) -> (i32, i32) {
    %c0_i32 = arith.constant 0 : i32
    %c0_i32_0 = arith.constant 0 : i32
    %c0_i32_1 = arith.constant 0 : i32
    return %c0_i32, %c0_i32_0 : i32, i32
  }
  func.func @transform_8(%arg0: i32) -> (i32, i32) {
    %c0_i32 = arith.constant 0 : i32
    %c0_i32_0 = arith.constant 0 : i32
    %c0_i32_1 = arith.constant 0 : i32
    return %c0_i32, %c0_i32_0 : i32, i32
  }
  func.func @transform_9(%arg0: i32) -> (i32, i32) {
    %c0_i32 = arith.constant 0 : i32
    %c0_i32_0 = arith.constant 0 : i32
    return %c0_i32, %arg0 : i32, i32
  }
}

</mosaic_0001>

<bundles_post_ra>
// kernel: tpu_custom_call.1
= control target key start
LH: loop header
LB: loop body
LE: loop exit
PB: predicated region body
PF: predicated region fallthrough
CT: control target
= control target key end

     0   :  { %v461_v1 = vmov 0   ;;  %s585_s0 = inlined_call_operand.vmem [shape: f32[8,1], index: 0, kind: input, shape index: {}]   ;;  %s586_s1 = inlined_call_operand.vmem [shape: f32[8,1], index: 1, kind: input, shape index: {}]   ;;  %s587_s2 = inlined_call_operand.vmem [shape: f32[8,128], index: 2, kind: input, shape index: {}]   ;;  %s588_s3 = inlined_call_operand.vmem [shape: f32[32,8], index: 3, kind: input, shape index: {}]   ;;  %s589_s4 = inlined_call_operand.vmem [shape: f32[32,1], index: 4, kind: input, shape index: {}]   ;;  %s590_s5 = inlined_call_operand.vmem [shape: f32[16,32], index: 5, kind: input, shape index: {}]   ;;  %s591_s6 = inlined_call_operand.vmem [shape: f32[16,1], index: 6, kind: input, shape index: {}]   ;;  %s592_s7 = inlined_call_operand.vmem [shape: f32[4,16], index: 7, kind: input, shape index: {}]   ;;  %s593_s8 = inlined_call_operand.vmem [shape: f32[4,1], index: 8, kind: input, shape index: {}]   ;;  %s594_s9 = inlined_call_operand.hbm [shape: f32[4,128], index: 9, kind: output, shape index: {}]  }
   0x1   :  { %v34_v0 = vld [vmem:[%s585_s0] sm:$0xff]  ;;  %435 = vset.pattern.permute.xlu0 %v461_v1  ;;  %436 = vset.pattern.permute.xlu1 %v461_v1 }
   0x2   :  { %37 = vperm.xlu0 %435, %v34_v0  }
   0x3   :  { %14 = vsyncpa [#allocation3], 0  ;;  %v41_v2 = vld [vmem:[%s586_s1] sm:$0xff]  ;;  %v54_v3 = vld [vmem:[%s589_s4 + $0x10] sm:$0xff]  ;;  %vm76_vm0 = vcmask 64512   ;;  %vm192_vm1 = vcmask 261120  }
   0x4   :  { %v48_v4 = vld [vmem:[%s588_s3] sm:$0xff]  ;;  %v53_v8 = vld [vmem:[%s589_s4 + $0x8] sm:$0xff]  ;;  %v55_v9 = vld [vmem:[%s589_s4 + $0x18] sm:$0xff]  ;;  %v462_v39 = vmov 0.0|0.0   ;;  %vm463_vm2 = vmmov 0   ;;  %v464_v40 = vmov 0.0  }
   0x5   :  { %395 = vmatprep.mubr.msk.f32.mxu0 %vm76_vm0, %v48_v4  ;;  %v180_v5 = vld [vmem:[%s591_s6] sm:$0xff]  ;;  %v181_v10 = vld [vmem:[%s591_s6 + $0x8] sm:$0xff]  ;;  %v50_v17 = vld [vmem:[%s588_s3 + $0x10] sm:$0xff]  ;;  %vm283_vm3 = vcmask 130048  }
   0x6   :  { %44 = vperm.xlu0 %435, %v41_v2   ;;  %v277_v6 = vld [vmem:[%s593_s8] sm:$0xf]  ;;  %v49_v16 = vld [vmem:[%s588_s3 + $0x8] sm:$0xff]  ;;  %v51_v18 = vld [vmem:[%s588_s3 + $0x18] sm:$0xff] }
   0x7   :  { %v52_v7 = vld [vmem:[%s589_s4] sm:$0xff]  ;;  %v179_v38 = vld [vmem:[%s590_s5 + $0x8] sm:$0xff] }
   0x8   :  { %58 = vperm.xlu1 %436, %v52_v7   ;;  %v33_v12 = vld [vmem:[%s587_s2] sm:$0xff] }
   0x9   :  { %v178_v19 = vld [vmem:[%s590_s5] sm:$0xff]  ;;  %s465_s5 = smov [#allocation2]  }
   0xa   :  { %68 = vperm.xlu0 %435, %v54_v3   ;;  %409 = vmatprep.mubr.msk.f32.mxu1 %vm192_vm1, %v178_v19  ;;  %v276_v50 = vld [vmem:[%s592_s7] sm:$0xf]  ;;  %s364_s15 = sshll.u32 %s465_s5, 4  ;;  %s365_s15 = int_to_ptr.vmem [resolvable:$true] %s364_s15 }
   0xb   :  { %s437_s16 = scalar_lea.vmem %s365_s15, 64  ;;  %p442_p1 = scmp.lt.s32.totalorder %s365_s15, %s365_s15 }
   0xc   :  { %63 = vperm.xlu1 %436, %v53_v8   ;;  %p438_p0 = scmp.ne.s32.totalorder %s365_s15, %s437_s16  ;;  %p443_p2 = scmp.lt.s32.totalorder %s437_s16, %s437_s16 }
   0xe   :  { %184 = vperm.xlu0 %435, %v180_v5   ;;  %p444_p3 = por %p443_p2, %p442_p1 }
  0x10   :  { %73 = vperm.xlu1 %436, %v55_v9   ;;  %p445_p4 = pnand %p444_p3, %p438_p0 }
  0x12   :  { %280 = vperm.xlu0 %435, %v277_v6  }
  0x14   :  { %189 = vperm.xlu1 %436, %v181_v10  }
  0x81   :  { %v38_v11 = vpop.permute.xlu0 %37 }
  0x82   :  { %v40_v13 = vsub.f32 %v33_v12, %v38_v11 }
  0x85   :  { %v45_v14 = vpop.permute.xlu0 %44 }
  0x86   :  { %v47_v15 = vmul.f32 %v45_v14, %v40_v13 }
  0x87   :  { %v59_v20 = vpop.permute.xlu1 %58 }
  0x88   :  { %393 = vmatprep.subr.mxu0 %v47_v15 }
  0x89   :  { %394 = vmatpush3.msra.mxu0 %v47_v15  ;;  %v69_v30 = vpop.permute.xlu0 %68 }
  0x8a   :  { %396 = vmatmul.mubr.msk.f32.vlgmr.msra.gmra.mrb[0].mxu0 %vm76_vm0, %v49_v16  ;;  %427 = vmatprep.subr.bf16.mxu0 %v462_v39 }
  0x8b   :  { %398 = vmatprep.mubr.msk.f32.mxu0 %vm76_vm0, %v50_v17  ;;  %v64_v21 = vpop.permute.xlu1 %63 }
  0x8d   :  { %v185_v43 = vpop.permute.xlu0 %184 }
  0x8e   :  { %399 = vmatmul.mubr.msk.f32.gmra.mrb[2].mxu0 %vm76_vm0, %v51_v18 }
  0x8f   :  { %v74_v27 = vpop.permute.xlu1 %73  ;;  %416 = vmatprep.mubr.msk.f32.mxu0 %vm463_vm2, %v464_v40 }
  0x91   :  { %v281_v51 = vpop.permute.xlu0 %280 }
  0x93   :  { %v190_v41 = vpop.permute.xlu1 %189 }
 0x15d   :  { %v397_v22 = vpop.f32.mrb[0].mxu0 }
 0x15e   :  { %v161_v23 = vadd.f32 %v397_v22, %v64_v21  ;;  %v155_v24 = vpop.f32.mrb[1].mxu0 }
 0x15f   :  { %v156_v25 = vadd.f32 %v155_v24, %v59_v20 }
 0x160   :  { %v175_v26 = vmax.f32 %v161_v23, 0.0 }
 0x161   :  { %v174_v28 = vmax.f32 %v156_v25, 0.0  ;;  %v400_v29 = vpop.f32.mrb[2].mxu0 }
 0x162   :  { %v171_v31 = vadd.f32 %v400_v29, %v74_v27  ;;  %v165_v32 = vpop.f32.mrb[3].mxu0 }
 0x163   :  { %v166_v33 = vadd.f32 %v165_v32, %v69_v30  ;;  %v419_v34 = vpack.c.bf16 %v175_v26, %v174_v28 }
 0x164   :  { %v177_v35 = vmax.f32 %v171_v31, 0.0 }
 0x165   :  { %v176_v36 = vmax.f32 %v166_v33, 0.0  ;;  %420 = vmatprep.subr.bf16.mxu1 %v419_v34 }
 0x166   :  { %422 = vmatpush3.bf16.msra.mxu1 %v419_v34 }
 0x167   :  { %v423_v37 = vpack.c.bf16 %v177_v35, %v176_v36 }
 0x169   :  { %424 = vmatprep.subr.bf16.mxu1 %v423_v37 }
 0x16a   :  { %426 = vmatpush3.bf16.msra.mxu1 %v423_v37 }
 0x16d   :  { %410 = vmatmul.mubr.msk.f32.vlgmr.msra.gmra.mrb[0].mxu1 %vm192_vm1, %v179_v38 }
 0x240   :  { %v411_v42 = vpop.f32.mrb[0].mxu1 }
 0x241   :  { %v271_v44 = vadd.f32 %v411_v42, %v190_v41  ;;  %v265_v45 = vpop.f32.mrb[1].mxu1 }
 0x242   :  { %v266_v46 = vadd.f32 %v265_v45, %v185_v43 }
 0x243   :  { %v275_v47 = vmax.f32 %v271_v44, 0.0 }
 0x244   :  { %v274_v48 = vmax.f32 %v266_v46, 0.0 }
 0x246   :  { %v428_v49 = vpack.c.bf16 %v275_v47, %v274_v48 }
 0x248   :  { %429 = vmatpush3.bf16.msra.mxu0 %v428_v49 }
 0x24b   :  { %417 = vmatmul.mubr.msk.f32.vlgmr.msra.gmra.mrb[4].mxu0 %vm283_vm3, %v276_v50 }
 0x31e   :  { %v353_v52 = vpop.f32.mrb[4].mxu0 }
 0x31f   :  { %v354_v53 = vadd.f32 %v353_v52, %v281_v51  ;;  %v418_v54 = vpop.f32.mrb[5].mxu0 }
 0x321   :  { %357 = vst [vmem:[#allocation2] sm:$0xf] %v354_v53 }
 0x322   :  { %448 = shalt.err (!%p445_p4)
}
 0x323   :  { %s449_s7 = scalar_lea.hbm %s594_s9, 64 }
 0x324   :  { %p450_p5 = scmp.ne.s32.totalorder %s594_s9, %s449_s7  ;;  %p453_p6 = scmp.lt.u32.totalorder %s449_s7, %s594_s9 }
 0x326   :  { %p455_p7 = pnand %p453_p6, %p450_p5 }
 0x328   :  { %458 = shalt.err (!%p455_p7)
}
 0x329   :  { %367 = dma.vmem_to_hbm [thread:$0]  %s365_s15, 64, %s594_s9, [#allocation3]  }
 0x32a   :  { %459 = dma.done.wait [#allocation3], 64  }
 0x32b   :  { %460 = vsyncadd [#allocation3], 4294967232 }
 0x32c   :  { %371 = vsyncpa [#allocation3], 1 }

</bundles_post_ra>
